<compile_context>
chip_gen: v7x
topology: tpu7x:2x2x1
jax: 0.10.0
libtpu: 0.0.40
codegen_flags: <defaults>
</compile_context>

<pallas_src>
import jax
import jax.numpy as jnp
import numpy as np
from jax.experimental import pallas as pl
from jax.experimental.pallas import tpu as pltpu


def _se_kernel(x_ref, w1t_ref, b1_ref, w2t_ref, b2_ref, o_ref):
    """x_ref / o_ref: (Bb, C, HW) — channels on sublanes, spatial on lanes."""
    xs = x_ref[...]                                    # native dtype, no blanket upcast
    inv_hw = jnp.float32(1.0 / xs.shape[-1])

    # AdaptiveAvgPool2d(1): mean over all spatial positions, f32 accumulation.
    pooled = jnp.sum(xs, axis=-1, dtype=jnp.float32) * inv_hw            # (Bb, C)

    # fc[0]: Linear(C -> R) + fc[1]: ReLU   (weights pre-transposed, lanes carry R)
    h = jnp.dot(pooled, w1t_ref[...],
                preferred_element_type=jnp.float32) + b1_ref[...]        # (Bb, R)
    h = jnp.maximum(h, 0.0)

    # fc[2]: Linear(R -> C) + fc[3]: Sigmoid (lanes carry C)
    y = jnp.dot(h, w2t_ref[...],
                preferred_element_type=jnp.float32) + b2_ref[...]        # (Bb, C)
    y = jax.nn.sigmoid(y)

    # x * y  — per-channel gate broadcast over the lane (HW) axis.
    o_ref[...] = xs * y[:, :, None].astype(xs.dtype)


def _pick_block_batch(B, per_batch_bytes, target_bytes=2 << 20):
    """Largest divisor of B such that one x block stays ~target_bytes and the
    grid keeps at least 2 steps when B >= 2 (so both TensorCores get work)."""
    cap = max(1, target_bytes // max(per_batch_bytes, 1))
    if B >= 2:
        cap = min(cap, B // 2)
    cap = max(1, min(cap, B))
    bb = 1
    for d in range(1, cap + 1):
        if B % d == 0:
            bb = d
    return bb


def se_block(x, w1, b1, w2, b2):
    """Forward of the PyTorch `Block`.

    x: (B, C, H, W); w1: (R, C), b1: (R,), w2: (C, R), b2: (C,)
    (PyTorch nn.Linear weight layout is (out_features, in_features)).
    """
    B, C, H, W = x.shape
    R = w1.shape[0]
    HW = H * W
    itemsize = jnp.dtype(x.dtype).itemsize

    # NOTE: if HW < 128 a (B, HW, C) layout (C on lanes) would give denser
    # stores; not needed for the shapes exercised here (lane axis = HW >= 128).
    x2 = x.reshape(B, C, HW)
    w1t = jnp.asarray(w1).T.astype(jnp.float32)        # (C, R)
    w2t = jnp.asarray(w2).T.astype(jnp.float32)        # (R, C)
    b1r = jnp.asarray(b1).reshape(1, R).astype(jnp.float32)
    b2r = jnp.asarray(b2).reshape(1, C).astype(jnp.float32)

    Bb = _pick_block_batch(B, C * HW * itemsize)
    grid = (B // Bb,)

    cost = pl.CostEstimate(
        flops=int(4 * B * C * R + 3 * B * C * HW),
        transcendentals=int(B * C),
        bytes_accessed=int(2 * B * C * HW * itemsize + (2 * C * R + C + R) * 4),
    )

    out = pl.pallas_call(
        _se_kernel,
        out_shape=jax.ShapeDtypeStruct((B, C, HW), x.dtype),
        grid=grid,
        in_specs=[
            pl.BlockSpec((Bb, C, HW), lambda i: (i, 0, 0)),   # x, Bb batches per step
            pl.BlockSpec((C, R), lambda i: (0, 0)),           # fc1 weight (transposed)
            pl.BlockSpec((1, R), lambda i: (0, 0)),           # fc1 bias (lane-major)
            pl.BlockSpec((R, C), lambda i: (0, 0)),           # fc2 weight (transposed)
            pl.BlockSpec((1, C), lambda i: (0, 0)),           # fc2 bias (lane-major)
        ],
        out_specs=pl.BlockSpec((Bb, C, HW), lambda i: (i, 0, 0)),
        compiler_params=pltpu.CompilerParams(
            dimension_semantics=("parallel",),
            vmem_limit_bytes=32 * 1024 * 1024,
        ),
        cost_estimate=cost,
    )(x2, w1t, b1r, w2t, b2r)

    return out.reshape(B, C, H, W)


def se_block_ref(x, w1, b1, w2, b2):
    """Pure-JAX reference mirroring the PyTorch forward."""
    b, c, _, _ = x.shape
    y = jnp.mean(x, axis=(2, 3))                 # avg_pool(1).view(b, c)
    y = jnp.maximum(y @ w1.T + b1, 0.0)          # Linear + ReLU
    y = jax.nn.sigmoid(y @ w2.T + b2)            # Linear + Sigmoid
    return x * y.reshape(b, c, 1, 1)


if __name__ == "__main__":
    REDUCTION = 16

    key = jax.random.PRNGKey(0)
    kx, k1, k2, k3, k4, kx2 = jax.random.split(key, 6)

    # Deterministic parameters (PyTorch Linear weight shapes: (out, in))
    C = 32
    w1 = jax.random.normal(k1, (REDUCTION, C), dtype=jnp.float32) * 0.1
    b1 = jax.random.normal(k2, (REDUCTION,), dtype=jnp.float32) * 0.1
    w2 = jax.random.normal(k3, (C, REDUCTION), dtype=jnp.float32) * 0.1
    b2 = jax.random.normal(k4, (C,), dtype=jnp.float32) * 0.1

    # Case 1: small batch (Bb = 1, grid = (2,))
    x = jax.random.normal(kx, (2, C, 16, 16), dtype=jnp.float32)
    out = jax.block_until_ready(se_block(x, w1, b1, w2, b2))
    ref = se_block_ref(x, w1, b1, w2, b2)
    np.testing.assert_allclose(np.asarray(out), np.asarray(ref), rtol=1e-5, atol=1e-5)

    # Case 2: larger batch exercises the batched-block path (Bb > 1)
    x8 = jax.random.normal(kx2, (8, C, 16, 16), dtype=jnp.float32)
    out8 = jax.block_until_ready(se_block(x8, w1, b1, w2, b2))
    ref8 = se_block_ref(x8, w1, b1, w2, b2)
    np.testing.assert_allclose(np.asarray(out8), np.asarray(ref8), rtol=1e-5, atol=1e-5)

    print("KERNEL_OK")
</pallas_src>

<mosaic_0001>
module attributes {stable_mosaic.version = 11 : i64} {
  func.func @_se_kernel(%arg0: i32, %arg1: memref<1x32x256xf32, #tpu.memory_space<vmem>>, %arg2: memref<32x16xf32, #tpu.memory_space<vmem>>, %arg3: memref<1x16xf32, #tpu.memory_space<vmem>>, %arg4: memref<16x32xf32, #tpu.memory_space<vmem>>, %arg5: memref<1x32xf32, #tpu.memory_space<vmem>>, %arg6: memref<1x32x256xf32, #tpu.memory_space<vmem>>) attributes {dimension_semantics = [#tpu.dimension_semantics<parallel>], iteration_bounds = array<i64: 2>, scalar_prefetch = 0 : i64, scratch_operands = 0 : i64, tpu.core_type = #tpu.core_type<tc>, window_params = [{transform_indices = @transform_0, window_bounds = array<i64: 1, 32, 256>}, {pipeline_mode = #tpu.pipeline_mode<synchronous>, transform_indices = @transform_1, window_bounds = array<i64: 32, 16>}, {pipeline_mode = #tpu.pipeline_mode<synchronous>, transform_indices = @transform_2, window_bounds = array<i64: 1, 16>}, {pipeline_mode = #tpu.pipeline_mode<synchronous>, transform_indices = @transform_3, window_bounds = array<i64: 16, 32>}, {pipeline_mode = #tpu.pipeline_mode<synchronous>, transform_indices = @transform_4, window_bounds = array<i64: 1, 32>}, {transform_indices = @transform_5, window_bounds = array<i64: 1, 32, 256>}]} {
    %c0 = arith.constant 0 : index
    %c0_0 = arith.constant 0 : index
    %c0_1 = arith.constant 0 : index
    %0 = vector.load %arg1[%c0, %c0_0, %c0_1] : memref<1x32x256xf32, #tpu.memory_space<vmem>>, vector<1x32x256xf32>
    %cst = arith.constant dense<0.000000e+00> : vector<1x32xf32>
    %1 = vector.multi_reduction <add>, %0, %cst [2] : vector<1x32x256xf32> to vector<1x32xf32>
    %cst_2 = arith.constant 3.906250e-03 : f32
    %2 = vector.broadcast %cst_2 : f32 to vector<1x32xf32>
    %3 = arith.mulf %1, %2 : vector<1x32xf32>
    %c0_3 = arith.constant 0 : index
    %c0_4 = arith.constant 0 : index
    %4 = vector.load %arg2[%c0_3, %c0_4] : memref<32x16xf32, #tpu.memory_space<vmem>>, vector<32x16xf32>
    %cst_5 = arith.constant dense<0.000000e+00> : vector<1x16xf32>
    %5 = tpu.matmul %3, %4, %cst_5 {dimension_numbers = #tpu.dot_dimension_numbers<[1], [0], [0], [1], [0, 0, 1, 1], [], []>} : vector<1x32xf32>, vector<32x16xf32>, vector<1x16xf32> -> vector<1x16xf32>
    %c0_6 = arith.constant 0 : index
    %c0_7 = arith.constant 0 : index
    %6 = vector.load %arg3[%c0_6, %c0_7] : memref<1x16xf32, #tpu.memory_space<vmem>>, vector<1x16xf32>
    %7 = arith.addf %5, %6 : vector<1x16xf32>
    %cst_8 = arith.constant 0.000000e+00 : f32
    %8 = vector.broadcast %cst_8 : f32 to vector<1x16xf32>
    %9 = arith.maximumf %7, %8 : vector<1x16xf32>
    %c0_9 = arith.constant 0 : index
    %c0_10 = arith.constant 0 : index
    %10 = vector.load %arg4[%c0_9, %c0_10] : memref<16x32xf32, #tpu.memory_space<vmem>>, vector<16x32xf32>
    %cst_11 = arith.constant dense<0.000000e+00> : vector<1x32xf32>
    %11 = tpu.matmul %9, %10, %cst_11 {dimension_numbers = #tpu.dot_dimension_numbers<[1], [0], [0], [1], [0, 0, 1, 1], [], []>} : vector<1x16xf32>, vector<16x32xf32>, vector<1x32xf32> -> vector<1x32xf32>
    %c0_12 = arith.constant 0 : index
    %c0_13 = arith.constant 0 : index
    %12 = vector.load %arg5[%c0_12, %c0_13] : memref<1x32xf32, #tpu.memory_space<vmem>>, vector<1x32xf32>
    %13 = arith.addf %11, %12 : vector<1x32xf32>
    %14 = arith.negf %13 : vector<1x32xf32>
    %15 = math.exp %14 : vector<1x32xf32>
    %cst_14 = arith.constant 1.000000e+00 : f32
    %16 = vector.broadcast %cst_14 : f32 to vector<1x32xf32>
    %17 = arith.addf %16, %15 : vector<1x32xf32>
    %18 = arith.divf %16, %17 : vector<1x32xf32>
    %19 = vector.shape_cast %18 : vector<1x32xf32> to vector<1x32x1xf32>
    %20 = vector.broadcast %19 : vector<1x32x1xf32> to vector<1x32x256xf32>
    %21 = arith.mulf %0, %20 : vector<1x32x256xf32>
    %c0_15 = arith.constant 0 : index
    %c0_16 = arith.constant 0 : index
    %c0_17 = arith.constant 0 : index
    %22 = vector.load %arg6[%c0_15, %c0_16, %c0_17] : memref<1x32x256xf32, #tpu.memory_space<vmem>>, vector<1x32x256xf32>
    tpu.vector_store %arg6[%c0_15, %c0_16, %c0_17], %21 {strides = array<i32>} : memref<1x32x256xf32, #tpu.memory_space<vmem>>, vector<1x32x256xf32>,
    return
  }
  func.func @transform_0(%arg0: i32) -> (i32, i32, i32) {
    %c0_i32 = arith.constant 0 : i32
    %c0_i32_0 = arith.constant 0 : i32
    %c0_i32_1 = arith.constant 0 : i32
    return %arg0, %c0_i32, %c0_i32_0 : i32, i32, i32
  }
  func.func @transform_1(%arg0: i32) -> (i32, i32) {
    %c0_i32 = arith.constant 0 : i32
    %c0_i32_0 = arith.constant 0 : i32
    %c0_i32_1 = arith.constant 0 : i32
    return %c0_i32, %c0_i32_0 : i32, i32
  }
  func.func @transform_2(%arg0: i32) -> (i32, i32) {
    %c0_i32 = arith.constant 0 : i32
    %c0_i32_0 = arith.constant 0 : i32
    %c0_i32_1 = arith.constant 0 : i32
    return %c0_i32, %c0_i32_0 : i32, i32
  }
  func.func @transform_3(%arg0: i32) -> (i32, i32) {
    %c0_i32 = arith.constant 0 : i32
    %c0_i32_0 = arith.constant 0 : i32
    %c0_i32_1 = arith.constant 0 : i32
    return %c0_i32, %c0_i32_0 : i32, i32
  }
  func.func @transform_4(%arg0: i32) -> (i32, i32) {
    %c0_i32 = arith.constant 0 : i32
    %c0_i32_0 = arith.constant 0 : i32
    %c0_i32_1 = arith.constant 0 : i32
    return %c0_i32, %c0_i32_0 : i32, i32
  }
  func.func @transform_5(%arg0: i32) -> (i32, i32, i32) {
    %c0_i32 = arith.constant 0 : i32
    %c0_i32_0 = arith.constant 0 : i32
    %c0_i32_1 = arith.constant 0 : i32
    return %arg0, %c0_i32, %c0_i32_0 : i32, i32, i32
  }
}

</mosaic_0001>

<bundles_post_ra>
// kernel: tpu_custom_call.1
= control target key start
LH: loop header
LB: loop body
LE: loop exit
PB: predicated region body
PF: predicated region fallthrough
CT: control target
= control target key end

     0   :  { %10 = vsyncpa [#allocation3], 0  ;;  %s1052_s0 = inlined_call_operand.hbm [shape: f32[2,32,256], index: 0, kind: input, shape index: {}]   ;;  %s1053_s1 = inlined_call_operand.vmem [shape: f32[32,16], index: 1, kind: input, shape index: {}]   ;;  %s1054_s2 = inlined_call_operand.vmem [shape: f32[1,16], index: 2, kind: input, shape index: {}]   ;;  %s1055_s3 = inlined_call_operand.vmem [shape: f32[16,32], index: 3, kind: input, shape index: {}]   ;;  %s1056_s4 = inlined_call_operand.vmem [shape: f32[1,32], index: 4, kind: input, shape index: {}]   ;;  %s1057_s5 = inlined_call_operand.hbm [shape: f32[2,32,256], index: 5, kind: output, shape index: {}]  }
   0x1   :  { %12 = vsyncpa [#allocation3 + $0x1], 0 }
   0x2   :  { %13 = vsyncpa [#allocation4], 0 }
   0x3   :  { %15 = vsyncpa [#allocation4 + $0x1], 0  ;;  %s830_s18 = smov 0   ;;  %s832_s19 = smov 0  }
   0x4   :  { %s834_s20 = smov 0   ;;  %s836_s21 = smov 0  }
   0x5 LB: > { %s851_s22 = sadd.s32 4294967295, %s789_s21   ;;  %s582_s23 = sadd.s32 4294967294, %s789_s21   ;;  %s789_s21 = sphi %s836_s21, %s1070_s21   ;;  %s785_s20 = sphi %s834_s20, %s1069_s20   ;;  %s781_s19 = sphi %s832_s19, %s1068_s19   ;;  %s777_s18 = sphi %s830_s18, %s1067_s18  }
   0x6   : > { %s855_s24 = sadd.s32 1, %s789_s21   ;;  %s28_s25 = sadd.s32 1, %s785_s20 }
   0x7   : > { %s25_s26 = ssub.s32 %s789_s21, %s855_s24  ;;  %p35_p0 = scmp.ne.s32.totalorder %s785_s20, %s781_s19 }
   0x8   : > { %p26_p1 = scmp.eq.s32.totalorder %s25_s26, 0  ;;  %p36_p2 = scmp.eq.s32.totalorder %s789_s21, 0 }
   0x9   : > { %p41_p3 = scmp.ne.s32.totalorder %s781_s19, %s777_s18  ;;  %p42_p4 = scmp.eq.s32.totalorder %s851_s22, 0 }
   0xa   : > { %s867_s27 = scalar_select %p26_p1, %s785_s20, %s28_s25  }
   0xb   : > { %p869_p5 = por %p36_p2, %p35_p0  ;;  %p873_p6 = por %p42_p4, %p41_p3 }
   0xc   : > { %p149_p7 = scmp.eq.s32.totalorder %s851_s22, 1  ;;  %p155_p8 = scmp.eq.s32.totalorder %s582_s23, 1 }
   0xd   : > { %p648_p10 = scmp.lt.s32.totalorder %s789_s21, 2  ;;  %s187_s7 = sand.u32 1, %s785_s20  }
   0xe   : > { %p880_p11 = por %p149_p7, %p35_p0  ;;  %p884_p12 = por %p155_p8, %p41_p3 }
   0xf   : > { %s599_s8 = sshll.u32 %s789_s21, 10  ;;  %s585_s9 = sshll.u32 %s187_s7, 6 }
  0x10   : > { %s1061_s30 = scalar_select %p880_p11, 1, 0 }
  0x11   : > { %s1062_s6 = scalar_select %p884_p12, 1, 0 }
  0x12   : > { %s893_s12 = scalar_lea.hbm %s1052_s0, %s599_s8  ;;  %s191_s13 = scalar_lea.vmem [#allocation2], %s585_s9 }
  0x13   : > { %s198_s14 = sshll.u32 %s191_s13, 4  ;;  %p897_p13 = pnand %p648_p10, %p869_p5  ;;  %s901_s14 = int_to_ptr.vmem [resolvable:$true] %s198_s14 }
  0x14   : > { %s903_s16 = scalar_lea.sflag [#allocation3], %s187_s7  ;;  %s693_s17 = scalar_lea.hbm %s893_s12, 1024 }
  0x15   : > { %p694_p0 = scmp.ne.s32.totalorder %s893_s12, %s693_s17  ;;  %p695_p1 = pneg %p897_p13 }
  0x16   : > { %s698_s26 = scalar_lea.hbm %s1052_s0, 2048  ;;  %p699_p4 = scmp.lt.u32.totalorder %s893_s12, %s1052_s0 }
  0x17   : > { %p696_p2 = pnand %p695_p1, %p694_p0  ;;  %p700_p5 = scmp.lt.u32.totalorder %s698_s26, %s693_s17 }
  0x18   : > { %p702_p8 = scmp.lt.u32.totalorder %s693_s17, %s893_s12 }
  0x19   : > { %p697_p3 = pneg %p696_p2  ;;  %p701_p7 = por %p700_p5, %p699_p4 }
  0x1b   : > { %p703_p10 = por %p702_p8, %p701_p7 }
  0x1d   : > { %p704_p9 = pnand %p703_p10, %p697_p3 }
  0x1f   : > { %707 = shalt.err (!%p704_p9)
}
  0x20   : > { %s708_s7 = scalar_lea.vmem %s901_s14, 1024  ;;  %s791_s9 = smov [#allocation2]  }
  0x21   : > { %p709_p0 = scmp.ne.s32.totalorder %s901_s14, %s708_s7  ;;  %s713_s10 = sshll.u32 %s791_s9, 4  ;;  %s714_s10 = int_to_ptr.vmem [resolvable:$false] %s713_s10 }
  0x22   : > { %s715_s11 = scalar_lea.vmem %s714_s10, 2048  ;;  %p716_p11 = scmp.lt.s32.totalorder %s901_s14, %s714_s10 }
  0x23   : > { %p711_p2 = pnand %p709_p0, %p695_p1  ;;  %p717_p4 = scmp.lt.s32.totalorder %s715_s11, %s708_s7 }
  0x25   : > { %p712_p12 = pneg %p711_p2  ;;  %p718_p5 = por %p717_p4, %p716_p11 }
  0x27   : > { %p719_p7 = pnand %p718_p5, %p712_p12 }
  0x29   : > { %722 = shalt.err (!%p719_p7)
}
  0x2a   : > { %s792_s13 = smov 256   ;;  %s793_s17 = smov 16  }
  0x2b   : > { %643 = dma.hbm_to_vmem [thread:$0]  (!%p897_p13), %s893_s12, 1024, %s901_s14, %s903_s16, %s792_s13, %s792_s13, %s793_s17  }
  0x2c   : > { %p588_p9 = scmp.ge.s32.totalorder %s789_s21, 1  ;;  %p206_p1 = scmp.lt.s32.totalorder %s789_s21, 3 }
  0x2e   : > { %p207_p3 = pnand %p588_p9, %p206_p1 }
  0x2f   : > { %s934_s23 = sand.u32 (!%p207_p3), 1, %s781_s19  }
  0x30   : > { %210 = sbr.rel (%p207_p3) target bundleno = 810 (0x32a), region = 40  ;;  %s589_s25 = sshll.u32 (!%p207_p3), %s934_s23, 6 }
  0x31   : > { %s213_s26 = scalar_lea.sflag (!%p207_p3), [#allocation3], %s934_s23  ;;  %s216_s28 = scalar_lea.vmem (!%p207_p3), [#allocation2], %s589_s25 }
  0x37   : > { %768 = dma.done.wait (%p873_p6), %s213_s26, 1024  }
  0x38   : > { %770 = vsyncadd (%p873_p6), %s213_s26, 4294966272  ;;  %v944_v0 = vld [vmem:[%s216_s28] sm:$0xff]  ;;  %v946_v1 = vld [vmem:[%s216_s28 + $0x8] sm:$0xff]  ;;  %v794_v15 = vmov 0.0|0.0   ;;  %vm795_vm0 = vmmov 0   ;;  %v796_v19 = vmov 0.0   ;;  %v276_v20 = vlaneseq }
  0x39   : > { %v948_v2 = vld [vmem:[%s216_s28 + $0x20] sm:$0xff]  ;;  %v251_v3 = vadd.f32 %v946_v1, %v944_v0  ;;  %v952_v4 = vld [vmem:[%s216_s28 + $0x28] sm:$0xff]  ;;  %v954_v5 = vld [vmem:[%s216_s28 + $0x10] sm:$0xff]  ;;  %627 = vmatprep.subr.bf16.mxu0 %v794_v15  ;;  %633 = vmatprep.subr.bf16.mxu1 %v794_v15  ;;  %vm287_vm1 = vcmask 130112   ;;  %vm294_vm2 = vcmask 195712   ;;  %vm301_vm3 = vcmask 261312  }
  0x3a   : > { %v956_v6 = vld [vmem:[%s216_s28 + $0x18] sm:$0xff]  ;;  %v257_v7 = vadd.f32 %v952_v4, %v948_v2  ;;  %v960_v8 = vld [vmem:[%s216_s28 + $0x30] sm:$0xff]  ;;  %v267_v12 = vld [vmem:[%s1053_s1] sm:$0xff]  ;;  %617 = vmatprep.mubr.msk.f32.mxu0 %vm795_vm0, %v796_v19  ;;  %624 = vmatprep.mubr.msk.f32.mxu1 %vm795_vm0, %v796_v19  ;;  %v277_v21 = vand.u32 127, %v276_v20  ;;  %v279_v22 = vshrl.u32 %v276_v20, 7  ;;  %vm303_vm4 = vcmask 261120  }
  0x3b   : > { %v962_v9 = vld [vmem:[%s216_s28 + $0x38] sm:$0xff]  ;;  %252 = vadd.xlane.f32.xlu0 %v251_v3  ;;  %v254_v10 = vadd.f32 %v956_v6, %v954_v5  ;;  %v268_v13 = vld [vmem:[%s1053_s1 + $0x8] sm:$0xff]  ;;  %v269_v16 = vld [vmem:[%s1053_s1 + $0x10] sm:$0xff]  ;;  %vm380_vm5 = vcmask 130048   ;;  %s242_s14 = scalar_lea.vmem [#allocation5], %s589_s25  ;;  %s600_s16 = sshll.u32 %s851_s22, 10 }
  0x3c   : > { %258 = vadd.xlane.f32.xlu1 %v257_v7  ;;  %v260_v11 = vadd.f32 %v962_v9, %v960_v8  ;;  %v628_v14 = vpack.c.bf16 %v268_v13, %v267_v12  ;;  %v270_v17 = vld [vmem:[%s1053_s1 + $0x18] sm:$0xff]  ;;  %v282_v23 = vadd.s32 4294967288, %v277_v21  ;;  %v289_v25 = vadd.s32 4294967280, %v277_v21  ;;  %v377_v45 = vld [vmem:[%s1055_s3] sm:$0xff]  ;;  %v378_v46 = vld [vmem:[%s1055_s3 + $0x8] sm:$0xff]  ;;  %s509_s15 = sshll.u32 %s242_s14, 4  ;;  %s1006_s7 = scalar_lea.hbm %s1057_s5, %s600_s16  ;;  %s1001_s15 = int_to_ptr.vmem [resolvable:$true] %s509_s15 }
  0x3d   : > { %v631_v18 = vpack.c.bf16 %v270_v17, %v269_v16  ;;  %v296_v26 = vadd.s32 4294967272, %v277_v21  ;;  %v280_v28 = vsub.s32 %v277_v21, %v279_v22  ;;  %v634_v47 = vpack.c.bf16 %v378_v46, %v377_v45  ;;  %v271_v48 = vld [vmem:[%s1054_s2] sm:$0x1]  ;;  %s496_s22 = scalar_lea.sflag [#allocation4], %s934_s23  ;;  %s723_s9 = scalar_lea.vmem %s1001_s15, 1024 }
  0x3e   : > { %629 = vmatpush3.bf16.msra.mxu0 %v628_v14  ;;  %v285_v30 = vsub.s32 %v282_v23, %v279_v22  ;;  %v292_v31 = vsub.s32 %v289_v25, %v279_v22  ;;  %v379_v53 = vld [vmem:[%s1056_s4] sm:$0x1]  ;;  %v462_v60 = vsub.s32 0, %v279_v22  ;;  %p724_p6 = scmp.ne.s32.totalorder %s1001_s15, %s723_s9  ;;  %p1064_p11 = scmp.ne.s32.totalorder %s1061_s30, 0 }
  0x3f   : > { %255 = vadd.xlane.f32.xlu0 %v254_v10  ;;  %630 = vmatprep.subr.bf16.mxu0 %v794_v15  ;;  %v299_v34 = vsub.s32 %v296_v26, %v279_v22  ;;  %s797_s10 = smov [#allocation5]  }
  0x40   : > { %261 = vadd.xlane.f32.xlu1 %v260_v11  ;;  %635 = vmatpush3.bf16.msra.mxu1 %v634_v47  ;;  %p725_p12 = pnand %p724_p6, %p1064_p11  ;;  %s727_s11 = sshll.u32 %s797_s10, 4  ;;  %s728_s11 = int_to_ptr.vmem [resolvable:$false] %s727_s11 }
  0x41   : > { %s729_s13 = scalar_lea.vmem %s728_s11, 2048  ;;  %p730_p8 = scmp.lt.s32.totalorder %s1001_s15, %s728_s11 }
  0x42   : > { %632 = vmatpush3.bf16.msra.mxu0 %v631_v18  ;;  %p726_p13 = pneg %p725_p12  ;;  %p731_p10 = scmp.lt.s32.totalorder %s729_s13, %s723_s9 }
  0x44   : > { %p732_p0 = por %p731_p10, %p730_p8 }
  0x46   : > { %p733_p2 = pnand %p732_p0, %p726_p13 }
  0xc8   : > { %v253_v24 = vpop.xlane.xlu0 %252 }
  0xc9   : > { %v259_v27 = vpop.xlane.xlu1 %258  ;;  %v263_v29 = vmul.f32 0.00390625, %v253_v24 }
  0xca   : > { %v265_v32 = vmul.f32 0.00390625, %v259_v27 }
  0xcb   : > { %v281_v38 = vrot.slane %v263_v29, %v280_v28 }
  0xcc   : > { %v256_v33 = vpop.xlane.xlu0 %255  ;;  %v293_v40 = vrot.slane %v265_v32, %v292_v31 }
  0xcd   : > { %v264_v35 = vmul.f32 0.00390625, %v256_v33  ;;  %v262_v36 = vpop.xlane.xlu1 %261 }
  0xce   : > { %v266_v37 = vmul.f32 0.00390625, %v262_v36 }
  0xcf   : > { %v286_v39 = vrot.slane %v264_v35, %v285_v30 }
  0xd0   : > { %v300_v41 = vrot.slane %v266_v37, %v299_v34 }
  0xd1   : > { %v288_v42 = vsel %vm287_vm1, %v286_v39, %v281_v38 }
  0xd2   : > { %v295_v43 = vsel %vm294_vm2, %v293_v40, %v288_v42 }
  0xd3   : > { %v302_v44 = vsel %vm301_vm3, %v300_v41, %v295_v43 }
  0xd4   : > { %618 = vmatmul.mubr.msk.f32.vlgmr.msra.gmra.mrb[0].mxu0 %vm303_vm4, %v302_v44 }
 0x1a7   : > { %v372_v49 = vpop.f32.mrb[0].mxu0 }
 0x1a8   : > { %v373_v50 = vadd.f32 %v372_v49, %v271_v48  ;;  %v619_v51 = vpop.f32.mrb[1].mxu0 }
 0x1aa   : > { %v376_v52 = vmax.f32 %v373_v50, 0.0 }
 0x1ac   : > { %625 = vmatmul.mubr.msk.f32.vlgmr.msra.gmra.mrb[0].mxu1 %vm380_vm5, %v376_v52 }
 0x27f   : > { %v450_v54 = vpop.f32.mrb[0].mxu1 }
 0x280   : > { %v451_v55 = vadd.f32 %v450_v54, %v379_v53  ;;  %v626_v56 = vpop.f32.mrb[1].mxu1 }
 0x282   : > { %v593_v57 = vmul.f32 -1.442695, %v451_v55 }
 0x284   : > { %689 = vpow2.f32 %v593_v57 }
 0x28e   : > { %v690_v58 = vpop.eup %689 }
 0x28f   : > { %v457_v59 = vadd.f32 1.0, %v690_v58 }
 0x291   : > { %691 = vrcp.f32 %v457_v59 }
 0x29b   : > { %v692_v61 = vpop.eup %691 }
 0x29c   : > { %v463_v62 = vrot.slane %v692_v61, %v462_v60 }
 0x29e   : > { %469 = vbcast.lane.b32.xlu1 %v463_v62, 264  ;;  %465 = vbcast.lane.b32.xlu0 %v463_v62, 256 }
 0x2a2   : > { %473 = vbcast.lane.b32.xlu1 %v463_v62, 272 }
 0x2a6   : > { %477 = vbcast.lane.b32.xlu1 %v463_v62, 280 }
 0x310   : > { %v470_v63 = vpop.permute.xlu1 %469  ;;  %v466_v3 = vpop.permute.xlu0 %465 }
 0x311   : > { %v481_v7 = vmul.f32 %v470_v63, %v954_v5  ;;  %v482_v10 = vmul.f32 %v470_v63, %v956_v6  ;;  %v479_v11 = vmul.f32 %v466_v3, %v944_v0  ;;  %v480_v12 = vmul.f32 %v466_v3, %v946_v1 }
 0x313   : > { %489 = vst [vmem:[%s242_s14 + $0x10] sm:$0xff] %v481_v7  ;;  %490 = vst [vmem:[%s242_s14 + $0x18] sm:$0xff] %v482_v10 }
 0x314   : > { %487 = vst [vmem:[%s242_s14] sm:$0xff] %v479_v11  ;;  %488 = vst [vmem:[%s242_s14 + $0x8] sm:$0xff] %v480_v12  ;;  %v474_v13 = vpop.permute.xlu1 %473 }
 0x315   : > { %v483_v14 = vmul.f32 %v474_v13, %v948_v2  ;;  %v484_v5 = vmul.f32 %v474_v13, %v952_v4 }
 0x317   : > { %491 = vst [vmem:[%s242_s14 + $0x20] sm:$0xff] %v483_v14  ;;  %492 = vst [vmem:[%s242_s14 + $0x28] sm:$0xff] %v484_v5 }
 0x318   : > { %v478_v0 = vpop.permute.xlu1 %477 }
 0x319   : > { %v485_v1 = vmul.f32 %v478_v0, %v960_v8  ;;  %v486_v2 = vmul.f32 %v478_v0, %v962_v9 }
 0x31b   : > { %493 = vst [vmem:[%s242_s14 + $0x30] sm:$0xff] %v485_v1  ;;  %494 = vst [vmem:[%s242_s14 + $0x38] sm:$0xff] %v486_v2 }
 0x31c   : > { %736 = shalt.err (!%p733_p2)
}
 0x31d   : > { %s737_s17 = scalar_lea.hbm %s1006_s7, 1024  ;;  %s741_s29 = scalar_lea.hbm %s1057_s5, 2048 }
 0x31e   : > { %p738_p4 = scmp.ne.s32.totalorder %s1006_s7, %s737_s17  ;;  %p742_p9 = scmp.lt.u32.totalorder %s1006_s7, %s1057_s5 }
 0x31f   : > { %p743_p1 = scmp.lt.u32.totalorder %s741_s29, %s737_s17  ;;  %p745_p6 = scmp.lt.u32.totalorder %s737_s17, %s1006_s7 }
 0x320   : > { %p739_p5 = pnand %p738_p4, %p1064_p11 }
 0x321   : > { %p744_p3 = por %p743_p1, %p742_p9 }
 0x322   : > { %p740_p7 = pneg %p739_p5 }
 0x323   : > { %p746_p12 = por %p745_p6, %p744_p3 }
 0x325   : > { %p747_p13 = pnand %p746_p12, %p740_p7 }
 0x327   : > { %750 = shalt.err (!%p747_p13)
}
 0x328   : > { %s798_s16 = smov 256   ;;  %s799_s25 = smov 16  }
 0x329   : > { %638 = dma.vmem_to_hbm [thread:$0]  (%p1064_p11), %s1001_s15, 1024, %s1006_s7, %s496_s22, %s798_s16, %s798_s16, %s799_s25  }
 0x32a PF: > { %s524_s8 = sand.u32 1, %s777_s18   ;;  %p1065_p8 = scmp.ne.s32.totalorder %s1062_s6, 0 }
 0x32b   : > { %p1066_p10 = scmp.ge.s32.totalorder %s789_s21, 2  ;;  %s525_s9 = scalar_lea.sflag [#allocation4], %s524_s8 }
 0x32d   : > { %p645_p0 = pnand %p1066_p10, %p1065_p8 }
 0x32f   : > { %772 = dma.done.wait (!%p645_p0), %s525_s9, 1024  }
 0x330   : > { %774 = vsyncadd (!%p645_p0), %s525_s9, 4294966272  ;;  %p18_p2 = scmp.ge.s32.totalorder %s855_s24, 4   ;;  %s1067_s18 = smov %s781_s19 }
 0x331   : > { %s1068_s19 = smov %s785_s20  ;;  %s1069_s20 = smov %s867_s27 }
 0x332   : > { %s1070_s21 = smov %s855_s24  ;;  %20 = sbr.rel (!%p18_p2) target bundleno = 5 (0x5), region = 85 }
 0x339   :  { %530 = vsyncpa [#allocation3], 1 }
 0x33a   :  { %532 = vsyncpa [#allocation3 + $0x1], 1 }
 0x33b   :  { %533 = vsyncpa [#allocation4], 1 }
 0x33c   :  { %535 = vsyncpa [#allocation4 + $0x1], 1 }

</bundles_post_ra>
